<compile_context>
chip_gen: v7x
topology: tpu7x:2x2x1
jax: 0.10.0
libtpu: 0.0.40
codegen_flags: <defaults>
</compile_context>

<pallas_src>
import functools

import jax
import jax.numpy as jnp
from jax.experimental import pallas as pl
from jax.experimental.pallas import tpu as pltpu


def _lif_kernel(x_ref, out_ref, cnt_ref, u_ref, acc_ref, *, v_th, decay):
    t = pl.program_id(1)  # time axis (innermost, sequential recurrence)

    # Reset membrane potential + per-lane spike accumulator at the start of
    # every P-tile's time loop.
    @pl.when(t == 0)
    def _():
        u_ref[...] = jnp.zeros_like(u_ref)
        acc_ref[...] = jnp.zeros_like(acc_ref)

    x_t = x_ref[0].astype(jnp.float32)              # (TILE_P, LANES)
    u = u_ref[...] * decay + x_t                    # leak + integrate
    fired = u > v_th
    spike = jnp.where(fired, 1.0, 0.0)              # Heaviside forward
    u_ref[...] = jnp.where(fired, 0.0, u)           # hard reset
    out_ref[0] = spike.astype(out_ref.dtype)
    acc_ref[...] += spike                           # per-lane partial sums (VPU)

    # Single cross-lane reduction per P-tile, outside the hot loop.
    @pl.when(t == pl.num_programs(1) - 1)
    def _():
        cnt_ref[...] = jnp.zeros_like(cnt_ref) + jnp.sum(acc_ref[...])


def lif_act_csr(x, v_th=1.0, decay=0.25, out_dtype=None):
    """x: [T, ...] float array (e.g. [T, B, C, H, W]).

    Returns (out, spike_count) where out has the same shape as x and
    spike_count mirrors the `self.spikes` counter of LIFAct_csr.
    """
    T = x.shape[0]
    rest = x.shape[1:]
    N = 1
    for d in rest:
        N *= d
    out_dtype = x.dtype if out_dtype is None else out_dtype

    # Lane-dense layout: view each timestep as rows of LANES elements.
    LANES = next((c for c in (1024, 512, 256, 128) if N % c == 0), 128)
    R = pl.cdiv(N, LANES)

    # Row tile targeting ~2 MiB per f32 buffer (fits comfortably in scoped
    # VMEM on v5e/v6e/v7x with double-buffered in/out + 2 scratch buffers).
    target_rows = max(8, (2 * 1024 * 1024) // (LANES * 4))
    tile_p = min(target_rows, -(-R // 8) * 8)
    TILE_P = -(-tile_p // 8) * 8                    # multiple of 8 sublanes
    R_pad = -(-R // TILE_P) * TILE_P
    N_pad = R_pad * LANES
    P_TILES = R_pad // TILE_P

    xf = x.reshape(T, N)
    if N_pad != N:
        # Zero padding never spikes (u stays 0 <= V_th) -> count is exact.
        xf = jnp.pad(xf, ((0, 0), (0, N_pad - N)))
    xf = xf.reshape(T, R_pad, LANES)

    kernel = functools.partial(_lif_kernel, v_th=float(v_th), decay=float(decay))

    out_f, cnt = pl.pallas_call(
        kernel,
        out_shape=(
            jax.ShapeDtypeStruct((T, R_pad, LANES), out_dtype),
            jax.ShapeDtypeStruct((P_TILES, 1, 1), jnp.float32),  # per-tile counts
        ),
        grid_spec=pltpu.PrefetchScalarGridSpec(
            num_scalar_prefetch=0,
            grid=(P_TILES, T),  # rows outer (parallel), time inner (recurrence)
            in_specs=[
                pl.BlockSpec((1, TILE_P, LANES), lambda p, t: (t, p, 0)),
            ],
            out_specs=(
                pl.BlockSpec((1, TILE_P, LANES), lambda p, t: (t, p, 0)),
                pl.BlockSpec((1, 1, 1), lambda p, t: (p, 0, 0)),
            ),
            scratch_shapes=[
                pltpu.VMEM((TILE_P, LANES), jnp.float32),  # membrane u
                pltpu.VMEM((TILE_P, LANES), jnp.float32),  # per-lane spike acc
            ],
        ),
        compiler_params=pltpu.CompilerParams(
            dimension_semantics=("parallel", "arbitrary"),
        ),
    )(xf)

    out = out_f.reshape(T, N_pad)[:, :N].reshape((T,) + rest)
    # Note: f32 is exact for spike totals up to 2^24; cast per-tile counts as
    # needed downstream for very large workloads.
    spikes = jnp.sum(cnt)
    return out, spikes


def _lif_reference(x, v_th=1.0, decay=0.25):
    """Pure-JAX reference matching the PyTorch forward loop."""
    def step(u, x_t):
        u = u * decay + x_t
        spike = (u > v_th).astype(x.dtype)
        u = u * (1.0 - spike)
        return u, spike
    _, out = jax.lax.scan(step, jnp.zeros_like(x[0]), x)
    return out


if __name__ == "__main__":
    key = jax.random.PRNGKey(0)
    T, B, C, H, W = 8, 2, 4, 16, 16          # step=8, batch=2, channels=4, 16x16
    x = jax.random.normal(key, (T, B, C, H, W), dtype=jnp.float32) * 2.0

    out, spikes = lif_act_csr(x)
    out = jax.block_until_ready(out)
    spikes = jax.block_until_ready(spikes)

    ref = _lif_reference(x)
    assert out.shape == x.shape
    assert jnp.allclose(out.astype(jnp.float32), ref, atol=1e-6), "mismatch vs reference LIF"
    assert jnp.allclose(spikes, ref.sum(), atol=1e-3), "spike count mismatch"
    spike_rate = spikes / out.size  # mirrors LIFAct_csr.spike_rate()
    del spike_rate

    # TODO(synk): backward surrogate gradient (temp-shaped rectangle) is not
    # implemented; only the forward pass + spike-rate counter are ported.
    print("KERNEL_OK")
</pallas_src>

<mosaic_0001>
module attributes {stable_mosaic.version = 11 : i64} {
  func.func @_lif_kernel(%arg0: i32, %arg1: i32, %arg2: memref<1x8x1024xf32, #tpu.memory_space<vmem>>, %arg3: memref<1x8x1024xf32, #tpu.memory_space<vmem>>, %arg4: memref<1x1x1xf32, #tpu.memory_space<vmem>>, %arg5: memref<8x1024xf32, #tpu.memory_space<vmem>>, %arg6: memref<8x1024xf32, #tpu.memory_space<vmem>>) attributes {dimension_semantics = [#tpu.dimension_semantics<parallel>, #tpu.dimension_semantics<arbitrary>], iteration_bounds = array<i64: 1, 8>, scalar_prefetch = 0 : i64, scratch_operands = 2 : i64, tpu.core_type = #tpu.core_type<tc>, window_params = [{transform_indices = @transform_0, window_bounds = array<i64: 1, 8, 1024>}, {transform_indices = @transform_1, window_bounds = array<i64: 1, 8, 1024>}, {transform_indices = @transform_2, window_bounds = array<i64: 1, 1, 1>}]} {
    %c0_i32 = arith.constant 0 : i32
    %0 = arith.cmpi eq, %arg1, %c0_i32 : i32
    %1 = arith.extui %0 : i1 to i32
    %c0_i32_0 = arith.constant 0 : i32
    %2 = arith.cmpi ne, %1, %c0_i32_0 : i32
    scf.if %2 {
      %cst_19 = arith.constant 0.000000e+00 : f32
      %26 = vector.broadcast %cst_19 : f32 to vector<8x1024xf32>
      %c0_20 = arith.constant 0 : index
      %c0_21 = arith.constant 0 : index
      %27 = vector.load %arg5[%c0_20, %c0_21] : memref<8x1024xf32, #tpu.memory_space<vmem>>, vector<8x1024xf32>
      tpu.vector_store %arg5[%c0_20, %c0_21], %26 {strides = array<i32>} : memref<8x1024xf32, #tpu.memory_space<vmem>>, vector<8x1024xf32>,
      %cst_22 = arith.constant 0.000000e+00 : f32
      %28 = vector.broadcast %cst_22 : f32 to vector<8x1024xf32>
      %c0_23 = arith.constant 0 : index
      %c0_24 = arith.constant 0 : index
      %29 = vector.load %arg6[%c0_23, %c0_24] : memref<8x1024xf32, #tpu.memory_space<vmem>>, vector<8x1024xf32>
      tpu.vector_store %arg6[%c0_23, %c0_24], %28 {strides = array<i32>} : memref<8x1024xf32, #tpu.memory_space<vmem>>, vector<8x1024xf32>,
    } else {
    }
    %c0 = arith.constant 0 : index
    %c0_1 = arith.constant 0 : index
    %c0_2 = arith.constant 0 : index
    %3 = vector.load %arg2[%c0, %c0_1, %c0_2] : memref<1x8x1024xf32, #tpu.memory_space<vmem>>, vector<1x8x1024xf32>
    %4 = vector.shape_cast %3 : vector<1x8x1024xf32> to vector<8x1024xf32>
    %c0_3 = arith.constant 0 : index
    %c0_4 = arith.constant 0 : index
    %5 = vector.load %arg5[%c0_3, %c0_4] : memref<8x1024xf32, #tpu.memory_space<vmem>>, vector<8x1024xf32>
    %cst = arith.constant 2.500000e-01 : f32
    %6 = vector.broadcast %cst : f32 to vector<8x1024xf32>
    %7 = arith.mulf %5, %6 : vector<8x1024xf32>
    %8 = arith.addf %7, %4 : vector<8x1024xf32>
    %cst_5 = arith.constant 1.000000e+00 : f32
    %9 = vector.broadcast %cst_5 : f32 to vector<8x1024xf32>
    %10 = arith.cmpf ogt, %8, %9 : vector<8x1024xf32>
    %cst_6 = arith.constant 1.000000e+00 : f32
    %cst_7 = arith.constant 0.000000e+00 : f32
    %11 = vector.broadcast %cst_6 : f32 to vector<8x1024xf32>
    %12 = vector.broadcast %cst_7 : f32 to vector<8x1024xf32>
    %13 = arith.select %10, %11, %12 : vector<8x1024xi1>, vector<8x1024xf32>
    %cst_8 = arith.constant 0.000000e+00 : f32
    %14 = vector.broadcast %cst_8 : f32 to vector<8x1024xf32>
    %15 = arith.select %10, %14, %8 : vector<8x1024xi1>, vector<8x1024xf32>
    %c0_9 = arith.constant 0 : index
    %c0_10 = arith.constant 0 : index
    %16 = vector.load %arg5[%c0_9, %c0_10] : memref<8x1024xf32, #tpu.memory_space<vmem>>, vector<8x1024xf32>
    tpu.vector_store %arg5[%c0_9, %c0_10], %15 {strides = array<i32>} : memref<8x1024xf32, #tpu.memory_space<vmem>>, vector<8x1024xf32>,
    %c0_11 = arith.constant 0 : index
    %c0_12 = arith.constant 0 : index
    %c0_13 = arith.constant 0 : index
    %17 = vector.load %arg3[%c0_11, %c0_12, %c0_13] : memref<1x8x1024xf32, #tpu.memory_space<vmem>>, vector<1x8x1024xf32>
    %18 = vector.shape_cast %17 : vector<1x8x1024xf32> to vector<8x1024xf32>
    %19 = vector.shape_cast %13 : vector<8x1024xf32> to vector<1x8x1024xf32>
    tpu.vector_store %arg3[%c0_11, %c0_12, %c0_13], %19 {strides = array<i32>} : memref<1x8x1024xf32, #tpu.memory_space<vmem>>, vector<1x8x1024xf32>,
    %c0_14 = arith.constant 0 : index
    %c0_15 = arith.constant 0 : index
    %20 = vector.load %arg6[%c0_14, %c0_15] : memref<8x1024xf32, #tpu.memory_space<vmem>>, vector<8x1024xf32>
    %21 = arith.addf %20, %13 : vector<8x1024xf32>
    %c0_16 = arith.constant 0 : index
    %c0_17 = arith.constant 0 : index
    %22 = vector.load %arg6[%c0_16, %c0_17] : memref<8x1024xf32, #tpu.memory_space<vmem>>, vector<8x1024xf32>
    tpu.vector_store %arg6[%c0_16, %c0_17], %21 {strides = array<i32>} : memref<8x1024xf32, #tpu.memory_space<vmem>>, vector<8x1024xf32>,
    %c7_i32 = arith.constant 7 : i32
    %23 = arith.cmpi eq, %arg1, %c7_i32 : i32
    %24 = arith.extui %23 : i1 to i32
    %c0_i32_18 = arith.constant 0 : i32
    %25 = arith.cmpi ne, %24, %c0_i32_18 : i32
    scf.if %25 {
      %cst_19 = arith.constant 0.000000e+00 : f32
      %26 = vector.broadcast %cst_19 : f32 to vector<1x1x1xf32>
      %c0_20 = arith.constant 0 : index
      %c0_21 = arith.constant 0 : index
      %27 = vector.load %arg6[%c0_20, %c0_21] : memref<8x1024xf32, #tpu.memory_space<vmem>>, vector<8x1024xf32>
      %28 = vector.shape_cast %27 : vector<8x1024xf32> to vector<1x8x1024xf32>
      %cst_22 = arith.constant dense<0.000000e+00> : vector<1xf32>
      %29 = vector.multi_reduction <add>, %28, %cst_22 [1, 2] : vector<1x8x1024xf32> to vector<1xf32>
      %30 = vector.shape_cast %29 : vector<1xf32> to vector<1x1x1xf32>
      %31 = vector.extract %30[0, 0, 0] : f32 from vector<1x1x1xf32>
      %32 = vector.broadcast %31 : f32 to vector<1x1x1xf32>
      %33 = arith.addf %26, %32 : vector<1x1x1xf32>
      %c0_23 = arith.constant 0 : index
      %c0_24 = arith.constant 0 : index
      %c0_25 = arith.constant 0 : index
      %34 = vector.load %arg4[%c0_23, %c0_24, %c0_25] : memref<1x1x1xf32, #tpu.memory_space<vmem>>, vector<1x1x1xf32>
      tpu.vector_store %arg4[%c0_23, %c0_24, %c0_25], %33 {strides = array<i32>} : memref<1x1x1xf32, #tpu.memory_space<vmem>>, vector<1x1x1xf32>,
    } else {
    }
    return
  }
  func.func @transform_0(%arg0: i32, %arg1: i32) -> (i32, i32, i32) {
    %c0_i32 = arith.constant 0 : i32
    %c0_i32_0 = arith.constant 0 : i32
    return %arg1, %arg0, %c0_i32 : i32, i32, i32
  }
  func.func @transform_1(%arg0: i32, %arg1: i32) -> (i32, i32, i32) {
    %c0_i32 = arith.constant 0 : i32
    %c0_i32_0 = arith.constant 0 : i32
    return %arg1, %arg0, %c0_i32 : i32, i32, i32
  }
  func.func @transform_2(%arg0: i32, %arg1: i32) -> (i32, i32, i32) {
    %c0_i32 = arith.constant 0 : i32
    %c0_i32_0 = arith.constant 0 : i32
    %c0_i32_1 = arith.constant 0 : i32
    return %arg0, %c0_i32, %c0_i32_0 : i32, i32, i32
  }
}

</mosaic_0001>

<bundles_post_ra>
// kernel: tpu_custom_call.1
= control target key start
LH: loop header
LB: loop body
LE: loop exit
PB: predicated region body
PF: predicated region fallthrough
CT: control target
= control target key end

     0   :  { %8 = vsyncpa [#allocation5], 0  ;;  %s944_s0 = inlined_call_operand.hbm [shape: f32[8,8,1024], index: 0, kind: input, shape index: {}]   ;;  %s945_s1 = inlined_call_operand.hbm [shape: f32[8,8,1024], index: 1, kind: output, shape index: {0}]   ;;  %s946_s2 = inlined_call_operand.hbm [shape: f32[1,1,1], index: 2, kind: output, shape index: {1}]  }
   0x1   :  { %10 = vsyncpa [#allocation5 + $0x1], 0 }
   0x2   :  { %11 = vsyncpa [#allocation6], 0 }
   0x3   :  { %13 = vsyncpa [#allocation6 + $0x1], 0 }
   0x4   :  { %14 = vsyncpa [#allocation9], 0  ;;  %s715_s9 = smov 0   ;;  %s717_s10 = smov 0  }
   0x5   :  { %s719_s11 = smov 0   ;;  %s721_s12 = smov 0  }
   0x6   :  { %s723_s13 = smov 0   ;;  %s725_s14 = smov 0  }
   0x7 LB: > { %s457_s15 = sadd.s32 4294967295, %s693_s14   ;;  %s458_s16 = sadd.s32 4294967294, %s693_s14   ;;  %s693_s14 = sphi %s725_s14, %s20_s14   ;;  %s689_s13 = sphi %s723_s13, %s965_s13   ;;  %s685_s12 = sphi %s721_s12, %s964_s12   ;;  %s681_s11 = sphi %s719_s11, %s963_s11   ;;  %s677_s10 = sphi %s717_s10, %s962_s10   ;;  %s673_s9 = sphi %s715_s9, %s961_s9  }
   0x8   : > { %s29_s17 = sadd.s32 1, %s689_s13  ;;  %s41_s18 = sadd.s32 1, %s681_s11 }
   0x9   : > { %p30_p0 = scmp.ge.s32.totalorder %s29_s17, 8  ;;  %p48_p1 = scmp.ne.s32.totalorder %s681_s11, %s677_s10 }
   0xa   : > { %p49_p2 = scmp.eq.s32.totalorder %s693_s14, 0  ;;  %p54_p3 = scmp.ne.s32.totalorder %s677_s10, %s673_s9 }
   0xb   : > { %s967_s17 = smov (%p30_p0, %s29_s17), 0  ;;  %p55_p5 = scmp.eq.s32.totalorder %s457_s15, 0 }
   0xc   : > { %p756_p4 = por %p49_p2, %p48_p1  ;;  %s36_s20 = ssub.s32 %s689_s13, %s967_s17 }
   0xd   : > { %p762_p6 = scmp.eq.s32.totalorder %s457_s15, 7  ;;  %p39_p7 = scmp.eq.s32.totalorder %s36_s20, 0 }
   0xe   : > { %p766_p8 = por %p55_p5, %p54_p3  ;;  %p86_p10 = scmp.eq.s32.totalorder %s458_s16, 7 }
   0xf   : > { %s951_s21 = scalar_select %p762_p6, 1, 0 }
  0x10   : > { %p772_p9 = por %p762_p6, %p48_p1  ;;  %p779_p11 = por %p86_p10, %p54_p3 }
  0x11   : > { %s777_s24 = scalar_select %p39_p7, %s681_s11, %s41_s18  }
  0x12   : > { %s953_s23 = scalar_select %p772_p9, 1, 0 }
  0x13   : > { %s954_s25 = scalar_select %p779_p11, 1, 0 }
  0x14   : > { %p496_p12 = scmp.lt.s32.totalorder %s693_s14, 8  ;;  %s132_s26 = sand.u32 1, %s681_s11  }
  0x15   : > { %s461_s27 = sshll.u32 %s132_s26, 6  ;;  %s476_s28 = sshll.u32 %s689_s13, 10 }
  0x16   : > { %s789_s3 = scalar_lea.hbm %s944_s0, %s476_s28  ;;  %s136_s4 = scalar_lea.vmem [#allocation4], %s461_s27 }
  0x17   : > { %s146_s5 = sshll.u32 %s136_s4, 4  ;;  %p795_p13 = pnand %p496_p12, %p756_p4  ;;  %s791_s5 = int_to_ptr.vmem [resolvable:$true] %s146_s5 }
  0x18   : > { %s133_s7 = scalar_lea.sflag [#allocation5], %s132_s26  ;;  %s551_s8 = scalar_lea.hbm %s789_s3, 1024 }
  0x19   : > { %p552_p2 = scmp.ne.s32.totalorder %s789_s3, %s551_s8  ;;  %p553_p3 = pneg %p795_p13 }
  0x1a   : > { %s556_s18 = scalar_lea.hbm %s944_s0, 8192  ;;  %p557_p4 = scmp.lt.u32.totalorder %s789_s3, %s944_s0 }
  0x1b   : > { %p554_p5 = pnand %p553_p3, %p552_p2  ;;  %p558_p10 = scmp.lt.u32.totalorder %s556_s18, %s551_s8 }
  0x1c   : > { %p560_p0 = scmp.lt.u32.totalorder %s551_s8, %s789_s3 }
  0x1d   : > { %p555_p7 = pneg %p554_p5  ;;  %p559_p12 = por %p558_p10, %p557_p4 }
  0x1f   : > { %p561_p1 = por %p560_p0, %p559_p12 }
  0x21   : > { %p562_p11 = pnand %p561_p1, %p555_p7 }
  0x23   : > { %565 = shalt.err (!%p562_p11)
}
  0x24   : > { %s566_s26 = scalar_lea.vmem %s791_s5, 1024  ;;  %s695_s27 = smov [#allocation4]  }
  0x25   : > { %p567_p2 = scmp.ne.s32.totalorder %s791_s5, %s566_s26  ;;  %s571_s28 = sshll.u32 %s695_s27, 4  ;;  %s572_s28 = int_to_ptr.vmem [resolvable:$false] %s571_s28 }
  0x26   : > { %s573_s29 = scalar_lea.vmem %s572_s28, 2048  ;;  %p574_p9 = scmp.lt.s32.totalorder %s791_s5, %s572_s28 }
  0x27   : > { %p569_p5 = pnand %p567_p2, %p553_p3  ;;  %p575_p4 = scmp.lt.s32.totalorder %s573_s29, %s566_s26 }
  0x29   : > { %p570_p6 = pneg %p569_p5  ;;  %p576_p10 = por %p575_p4, %p574_p9 }
  0x2b   : > { %p577_p0 = pnand %p576_p10, %p570_p6 }
  0x2d   : > { %580 = shalt.err (!%p577_p0)
}
  0x2e   : > { %491 = dma.hbm_to_vmem [thread:$0]  (!%p795_p13), %s789_s3, 1024, %s791_s5, %s133_s7  }
  0x2f   : > { %p956_p11 = scmp.lt.s32.totalorder %s693_s14, 9  ;;  %p957_p1 = scmp.ge.s32.totalorder %s693_s14, 1 }
  0x31   : > { %p152_p3 = pnand %p957_p1, %p956_p11 }
  0x32   : > { %s831_s30 = sand.u32 (!%p152_p3), 1, %s677_s10  }
  0x33   : > { %155 = sbr.rel (%p152_p3) target bundleno = 363 (0x16b), region = 24  ;;  %s465_s4 = sshll.u32 (!%p152_p3), %s831_s30, 6 }
  0x34   : > { %s158_s8 = scalar_lea.sflag (!%p152_p3), [#allocation5], %s831_s30  ;;  %s835_s15 = scalar_lea.vmem (!%p152_p3), [#allocation4], %s465_s4 }
  0x3a   : > { %660 = dma.done.wait (%p766_p8), %s158_s8, 1024  }
  0x3b   : > { %662 = vsyncadd (%p766_p8), %s158_s8, 4294966272  ;;  %s841_s3 = scalar_lea.vmem [#allocation7], %s465_s4  ;;  %p467_p6 = scmp.ne.s32.totalorder %s685_s12, 0 }
  0x3c   : > { %v696_v0 = vmov (!%p467_p6), 0.0  }
  0x3d   : > { %185 = sbr.rel (%p467_p6) target bundleno = 69 (0x45), region = 32  ;;  %186 = vst [vmem:[#allocation2] sm:$0xff] (!%p467_p6), %v696_v0  ;;  %187 = vst [vmem:[#allocation2 + $0x8] sm:$0xff] (!%p467_p6), %v696_v0 }
  0x3e   : > { %188 = vst [vmem:[#allocation2 + $0x10] sm:$0xff] (!%p467_p6), %v696_v0  ;;  %189 = vst [vmem:[#allocation2 + $0x18] sm:$0xff] (!%p467_p6), %v696_v0 }
  0x3f   : > { %190 = vst [vmem:[#allocation2 + $0x20] sm:$0xff] (!%p467_p6), %v696_v0  ;;  %191 = vst [vmem:[#allocation2 + $0x28] sm:$0xff] (!%p467_p6), %v696_v0 }
  0x40   : > { %192 = vst [vmem:[#allocation2 + $0x30] sm:$0xff] (!%p467_p6), %v696_v0  ;;  %193 = vst [vmem:[#allocation2 + $0x38] sm:$0xff] (!%p467_p6), %v696_v0 }
  0x41   : > { %194 = vst [vmem:[#allocation3] sm:$0xff] (!%p467_p6), %v696_v0  ;;  %195 = vst [vmem:[#allocation3 + $0x8] sm:$0xff] (!%p467_p6), %v696_v0 }
  0x42   : > { %196 = vst [vmem:[#allocation3 + $0x10] sm:$0xff] (!%p467_p6), %v696_v0  ;;  %197 = vst [vmem:[#allocation3 + $0x18] sm:$0xff] (!%p467_p6), %v696_v0 }
  0x43   : > { %198 = vst [vmem:[#allocation3 + $0x20] sm:$0xff] (!%p467_p6), %v696_v0  ;;  %199 = vst [vmem:[#allocation3 + $0x28] sm:$0xff] (!%p467_p6), %v696_v0 }
  0x44   : > { %200 = vst [vmem:[#allocation3 + $0x30] sm:$0xff] %v696_v0  ;;  %201 = vst [vmem:[#allocation3 + $0x38] sm:$0xff] %v696_v0 }
  0x45 PF: > { %v202_v1 = vld [vmem:[%s835_s15] sm:$0xff]  ;;  %v203_v3 = vld [vmem:[%s835_s15 + $0x8] sm:$0xff]  ;;  %v204_v6 = vld [vmem:[%s835_s15 + $0x10] sm:$0xff]  ;;  %v697_v38 = vmov 0.0   ;;  %p468_p8 = scmp.ne.s32.totalorder %s685_s12, 7 }
  0x46   : > { %v210_v2 = vld [vmem:[#allocation2] sm:$0xff]  ;;  %v211_v5 = vld [vmem:[#allocation2 + $0x8] sm:$0xff]  ;;  %v212_v7 = vld [vmem:[#allocation2 + $0x10] sm:$0xff]  ;;  %vm328_vm8 = vcmask (!%p468_p8), 0  }
  0x47   : > { %v218_v4 = vmul.f32 0.25, %v210_v2  ;;  %v219_v8 = vmul.f32 0.25, %v211_v5  ;;  %v220_v9 = vmul.f32 0.25, %v212_v7  ;;  %v205_v10 = vld [vmem:[%s835_s15 + $0x18] sm:$0xff]  ;;  %v206_v14 = vld [vmem:[%s835_s15 + $0x20] sm:$0xff]  ;;  %v215_v16 = vld [vmem:[#allocation2 + $0x28] sm:$0xff] }
  0x48   : > { %v213_v11 = vld [vmem:[#allocation2 + $0x18] sm:$0xff]  ;;  %v214_v15 = vld [vmem:[#allocation2 + $0x20] sm:$0xff]  ;;  %v207_v20 = vld [vmem:[%s835_s15 + $0x28] sm:$0xff]  ;;  %v223_v21 = vmul.f32 0.25, %v215_v16 }
  0x49   : > { %v226_v12 = vadd.f32 %v218_v4, %v202_v1  ;;  %v221_v13 = vmul.f32 0.25, %v213_v11  ;;  %v227_v17 = vadd.f32 %v219_v8, %v203_v3  ;;  %v228_v18 = vadd.f32 %v220_v9, %v204_v6  ;;  %v216_v22 = vld [vmem:[#allocation2 + $0x30] sm:$0xff]  ;;  %v217_v26 = vld [vmem:[#allocation2 + $0x38] sm:$0xff]  ;;  %v274_v36 = vld [vmem:[#allocation3] sm:$0xff] }
  0x4a   : > { %v222_v19 = vmul.f32 0.25, %v214_v15  ;;  %v208_v24 = vld [vmem:[%s835_s15 + $0x30] sm:$0xff]  ;;  %v224_v25 = vmul.f32 0.25, %v216_v22  ;;  %v231_v31 = vadd.f32 %v223_v21, %v207_v20  ;;  %v209_v32 = vld [vmem:[%s835_s15 + $0x38] sm:$0xff]  ;;  %v225_v35 = vmul.f32 0.25, %v217_v26  ;;  %v275_v41 = vld [vmem:[#allocation3 + $0x8] sm:$0xff] }
  0x4b   : > { %vm234_vm0 = vcmp.gt.f32.partialorder %v226_v12, 1.0  ;;  %v229_v23 = vadd.f32 %v221_v13, %v205_v10  ;;  %vm235_vm1 = vcmp.gt.f32.partialorder %v227_v17, 1.0  ;;  %vm236_vm2 = vcmp.gt.f32.partialorder %v228_v18, 1.0  ;;  %v276_v42 = vld [vmem:[#allocation3 + $0x10] sm:$0xff]  ;;  %v277_v46 = vld [vmem:[#allocation3 + $0x18] sm:$0xff]  ;;  %v278_v47 = vld [vmem:[#allocation3 + $0x20] sm:$0xff] }
  0x4c   : > { %v250_v27 = vsel %vm234_vm0, 0.0, %v226_v12  ;;  %v230_v28 = vadd.f32 %v222_v19, %v206_v14  ;;  %v251_v29 = vsel %vm235_vm1, 0.0, %v227_v17  ;;  %v252_v30 = vsel %vm236_vm2, 0.0, %v228_v18  ;;  %v279_v48 = vld [vmem:[#allocation3 + $0x28] sm:$0xff]  ;;  %v280_v53 = vld [vmem:[#allocation3 + $0x30] sm:$0xff]  ;;  %v281_v54 = vld [vmem:[#allocation3 + $0x38] sm:$0xff] }
  0x4d   : > { %258 = vst [vmem:[#allocation2] sm:$0xff] %v250_v27  ;;  %vm237_vm3 = vcmp.gt.f32.partialorder %v229_v23, 1.0  ;;  %259 = vst [vmem:[#allocation2 + $0x8] sm:$0xff] %v251_v29  ;;  %v232_v34 = vadd.f32 %v224_v25, %v208_v24  ;;  %vm239_vm5 = vcmp.gt.f32.partialorder %v231_v31, 1.0  ;;  %v242_v39 = vsel %vm234_vm0, 1.0, %v697_v38 }
  0x4e   : > { %260 = vst [vmem:[#allocation2 + $0x10] sm:$0xff] %v252_v30  ;;  %v253_v33 = vsel %vm237_vm3, 0.0, %v229_v23  ;;  %vm238_vm4 = vcmp.gt.f32.partialorder %v230_v28, 1.0  ;;  %v243_v40 = vsel %vm235_vm1, 1.0, %v697_v38  ;;  %v255_v43 = vsel %vm239_vm5, 0.0, %v231_v31  ;;  %266 = vst [vmem:[%s841_s3] sm:$0xff] %v242_v39 }
  0x4f   : > { %261 = vst [vmem:[#allocation2 + $0x18] sm:$0xff] %v253_v33  ;;  %v254_v37 = vsel %vm238_vm4, 0.0, %v230_v28  ;;  %vm240_vm6 = vcmp.gt.f32.partialorder %v232_v34, 1.0  ;;  %v233_v44 = vadd.f32 %v225_v35, %v209_v32  ;;  %267 = vst [vmem:[%s841_s3 + $0x8] sm:$0xff] %v243_v40  ;;  %v244_v45 = vsel %vm236_vm2, 1.0, %v697_v38 }
  0x50   : > { %262 = vst [vmem:[#allocation2 + $0x20] sm:$0xff] %v254_v37  ;;  %263 = vst [vmem:[#allocation2 + $0x28] sm:$0xff] %v255_v43  ;;  %v256_v49 = vsel %vm240_vm6, 0.0, %v232_v34  ;;  %v245_v50 = vsel %vm237_vm3, 1.0, %v697_v38  ;;  %v246_v51 = vsel %vm238_vm4, 1.0, %v697_v38  ;;  %v247_v52 = vsel %vm239_vm5, 1.0, %v697_v38 }
  0x51   : > { %268 = vst [vmem:[%s841_s3 + $0x10] sm:$0xff] %v244_v45  ;;  %264 = vst [vmem:[#allocation2 + $0x30] sm:$0xff] %v256_v49  ;;  %vm241_vm7 = vcmp.gt.f32.partialorder %v233_v44, 1.0  ;;  %v248_v55 = vsel %vm240_vm6, 1.0, %v697_v38  ;;  %v282_v56 = vadd.f32 %v274_v36, %v242_v39  ;;  %v283_v57 = vadd.f32 %v275_v41, %v243_v40 }
  0x52   : > { %269 = vst [vmem:[%s841_s3 + $0x18] sm:$0xff] %v245_v50  ;;  %270 = vst [vmem:[%s841_s3 + $0x20] sm:$0xff] %v246_v51  ;;  %v257_v58 = vsel %vm241_vm7, 0.0, %v233_v44  ;;  %v249_v59 = vsel %vm241_vm7, 1.0, %v697_v38  ;;  %v284_v60 = vadd.f32 %v276_v42, %v244_v45  ;;  %v285_v61 = vadd.f32 %v277_v46, %v245_v50  ;;  %301 = sbr.rel (%p468_p8) target bundleno = 313 (0x139), region = 36 }
  0x53   : > { %271 = vst [vmem:[%s841_s3 + $0x28] sm:$0xff] %v247_v52  ;;  %272 = vst [vmem:[%s841_s3 + $0x30] sm:$0xff] %v248_v55  ;;  %v286_v62 = vadd.f32 %v278_v47, %v246_v51  ;;  %v287_v63 = vadd.f32 %v279_v48, %v247_v52  ;;  %v288_v0 = vadd.f32 %v280_v53, %v248_v55 }
  0x54   : > { %265 = vst [vmem:[#allocation2 + $0x38] sm:$0xff] %v257_v58  ;;  %273 = vst [vmem:[%s841_s3 + $0x38] sm:$0xff] %v249_v59  ;;  %v289_v1 = vadd.f32 %v281_v54, %v249_v59 }
  0x55   : > { %290 = vst [vmem:[#allocation3] sm:$0xff] %v282_v56  ;;  %291 = vst [vmem:[#allocation3 + $0x8] sm:$0xff] %v283_v57 }
  0x56   : > { %292 = vst [vmem:[#allocation3 + $0x10] sm:$0xff] %v284_v60  ;;  %293 = vst [vmem:[#allocation3 + $0x18] sm:$0xff] %v285_v61 }
  0x57   : > { %294 = vst [vmem:[#allocation3 + $0x20] sm:$0xff] %v286_v62  ;;  %295 = vst [vmem:[#allocation3 + $0x28] sm:$0xff] %v287_v63 }
  0x58   : > { %296 = vst [vmem:[#allocation3 + $0x30] sm:$0xff] %v288_v0  ;;  %297 = vst [vmem:[#allocation3 + $0x38] sm:$0xff] %v289_v1 }
  0x5c   : > { %v302_v2 = vld [vmem:[#allocation3] sm:$0xff]  ;;  %v303_v3 = vld [vmem:[#allocation3 + $0x8] sm:$0xff] }
  0x5d   : > { %v304_v4 = vld [vmem:[#allocation3 + $0x10] sm:$0xff]  ;;  %v310_v5 = vadd.f32 %v303_v3, %v302_v2  ;;  %v305_v6 = vld [vmem:[#allocation3 + $0x18] sm:$0xff] }
  0x5e   : > { %v306_v8 = vld [vmem:[#allocation3 + $0x20] sm:$0xff]  ;;  %v307_v10 = vld [vmem:[#allocation3 + $0x28] sm:$0xff] }
  0x5f   : > { %v311_v7 = vadd.f32 %v310_v5, %v304_v4  ;;  %v308_v12 = vld [vmem:[#allocation3 + $0x30] sm:$0xff]  ;;  %v309_v14 = vld [vmem:[#allocation3 + $0x38] sm:$0xff] }
  0x61   : > { %v312_v9 = vadd.f32 %v311_v7, %v305_v6 }
  0x63   : > { %v313_v11 = vadd.f32 %v312_v9, %v306_v8 }
  0x65   : > { %v314_v13 = vadd.f32 %v313_v11, %v307_v10 }
  0x67   : > { %v315_v15 = vadd.f32 %v314_v13, %v308_v12 }
  0x69   : > { %v316_v16 = vadd.f32 %v315_v15, %v309_v14 }
  0x6b   : > { %317 = vadd.xlane.f32.xlu0 %v316_v16 }
  0xf8   : > { %v318_v17 = vpop.xlane.xlu0 %317 }
  0xf9   : > { %v319_v18 = vrot.slane %v318_v17, 4 }
  0xfb   : > { %v320_v19 = vadd.f32 %v319_v18, %v318_v17 }
  0xfd   : > { %v321_v20 = vrot.slane %v320_v19, 2 }
  0xff   : > { %v322_v21 = vadd.f32 %v321_v20, %v320_v19 }
 0x101   : > { %v323_v22 = vrot.slane %v322_v21, 1 }
 0x103   : > { %v324_v23 = vadd.f32 %v323_v22, %v322_v21 }
 0x105   : > { %478 = vpush %v324_v23 }
 0x136   : > { %s479_s22 = spop %478 }
 0x137   : > { %v326_v24 = vstv %s479_s22 }
 0x138   : > { %329 = vst.msk [vmem:[#allocation8] sm:$0x1] %vm328_vm8, %v326_v24 }
 0x139 PF: > { %s477_s5 = sshll.u32 %s685_s12, 10  ;;  %s347_s18 = sshll.u32 %s841_s3, 4  ;;  %s348_s18 = int_to_ptr.vmem [resolvable:$true] %s347_s18 }
 0x13a   : > { %s879_s16 = scalar_lea.hbm %s945_s1, %s477_s5  ;;  %s331_s19 = scalar_lea.sflag [#allocation6], %s831_s30 }
 0x13b   : > { %s581_s20 = scalar_lea.vmem %s348_s18, 1024  ;;  %p958_p13 = scmp.ne.s32.totalorder %s953_s23, 0 }
 0x13c   : > { %p582_p9 = scmp.ne.s32.totalorder %s348_s18, %s581_s20  ;;  %s698_s26 = smov [#allocation7]  }
 0x13d   : > { %s585_s27 = sshll.u32 %s698_s26, 4  ;;  %s586_s27 = int_to_ptr.vmem [resolvable:$false] %s585_s27 }
 0x13e   : > { %p583_p7 = pnand %p582_p9, %p958_p13  ;;  %s587_s28 = scalar_lea.vmem %s586_s27, 2048 }
 0x13f   : > { %p588_p2 = scmp.lt.s32.totalorder %s348_s18, %s586_s27  ;;  %p589_p5 = scmp.lt.s32.totalorder %s587_s28, %s581_s20 }
 0x140   : > { %p584_p12 = pneg %p583_p7 }
 0x141   : > { %p590_p4 = por %p589_p5, %p588_p2 }
 0x143   : > { %p591_p10 = pnand %p590_p4, %p584_p12 }
 0x145   : > { %594 = shalt.err (!%p591_p10)
}
 0x146   : > { %s595_s12 = scalar_lea.hbm %s879_s16, 1024  ;;  %s599_s4 = scalar_lea.hbm %s945_s1, 8192 }
 0x147   : > { %p596_p0 = scmp.ne.s32.totalorder %s879_s16, %s595_s12  ;;  %p600_p3 = scmp.lt.u32.totalorder %s879_s16, %s945_s1 }
 0x148   : > { %p601_p6 = scmp.lt.u32.totalorder %s599_s4, %s595_s12  ;;  %p603_p9 = scmp.lt.u32.totalorder %s595_s12, %s879_s16 }
 0x149   : > { %p597_p11 = pnand %p596_p0, %p958_p13 }
 0x14a   : > { %p602_p8 = por %p601_p6, %p600_p3 }
 0x14b   : > { %p598_p1 = pneg %p597_p11 }
 0x14c   : > { %p604_p7 = por %p603_p9, %p602_p8 }
 0x14e   : > { %p605_p12 = pnand %p604_p7, %p598_p1 }
 0x150   : > { %608 = shalt.err (!%p605_p12)
}
 0x151   : > { %482 = dma.vmem_to_hbm [thread:$0]  (%p958_p13), %s348_s18, 1024, %s879_s16, %s331_s19  }
 0x152   : > { %s699_s3 = smov [#allocation8]   ;;  %p959_p5 = scmp.ne.s32.totalorder %s951_s21, 0 }
 0x153   : > { %s360_s22 = sshll.u32 %s699_s3, 4  ;;  %s361_s22 = int_to_ptr.vmem [resolvable:$true] %s360_s22 }
 0x154   : > { %s609_s5 = scalar_lea.vmem %s361_s22, 16  ;;  %s615_s6 = scalar_lea.vmem %s361_s22, 32 }
 0x155   : > { %p610_p2 = scmp.ne.s32.totalorder %s361_s22, %s609_s5  ;;  %p616_p0 = scmp.lt.s32.totalorder %s361_s22, %s361_s22 }
 0x156   : > { %p617_p11 = scmp.lt.s32.totalorder %s615_s6, %s609_s5 }
 0x157   : > { %p611_p4 = pnand %p610_p2, %p959_p5 }
 0x158   : > { %p618_p3 = por %p617_p11, %p616_p0 }
 0x159   : > { %p612_p10 = pneg %p611_p4 }
 0x15b   : > { %p619_p6 = pnand %p618_p3, %p612_p10 }
 0x15d   : > { %622 = shalt.err (!%p619_p6)
}
 0x15e   : > { %s623_s23 = scalar_lea.hbm %s946_s2, 16 }
 0x15f   : > { %p624_p13 = scmp.ne.s32.totalorder %s946_s2, %s623_s23  ;;  %p629_p9 = scmp.lt.u32.totalorder %s623_s23, %s946_s2 }
 0x161   : > { %p625_p1 = pnand %p624_p13, %p959_p5 }
 0x163   : > { %p626_p8 = pneg %p625_p1 }
 0x165   : > { %p631_p7 = pnand %p629_p9, %p626_p8 }
 0x167   : > { %634 = shalt.err (!%p631_p7)
}
 0x168   : > { %484 = dma.vmem_to_hbm [thread:$0]  (%p959_p5), %s361_s22, 16, %s946_s2, [#allocation9]  }
 0x169   : > { %664 = dma.done.wait (%p959_p5), [#allocation9], 16  }
 0x16a   : > { %666 = vsyncadd (%p959_p5), [#allocation9], 4294967280 }
 0x16b PF: > { %p499_p12 = scmp.ge.s32.totalorder %s693_s14, 2  ;;  %s376_s12 = sand.u32 1, %s673_s9  }
 0x16c   : > { %p960_p2 = scmp.ne.s32.totalorder %s954_s25, 0  ;;  %s377_s29 = scalar_lea.sflag [#allocation6], %s376_s12 }
 0x16e   : > { %p493_p4 = pnand %p499_p12, %p960_p2 }
 0x170   : > { %668 = dma.done.wait (!%p493_p4), %s377_s29, 1024  }
 0x171   : > { %670 = vsyncadd (!%p493_p4), %s377_s29, 4294966272  ;;  %s20_s14 = sadd.s32 1, %s693_s14   ;;  %s961_s9 = smov %s677_s10 }
 0x172   : > { %p17_p10 = scmp.ge.s32.totalorder %s20_s14, 10   ;;  %s962_s10 = smov %s681_s11 }
 0x173   : > { %s963_s11 = smov %s777_s24  ;;  %s964_s12 = smov %s689_s13 }
 0x174   : > { %s965_s13 = smov %s967_s17  ;;  %19 = sbr.rel (!%p17_p10) target bundleno = 7 (0x7), region = 86 }
 0x17b   :  { %382 = vsyncpa [#allocation5], 1 }
 0x17c   :  { %384 = vsyncpa [#allocation5 + $0x1], 1 }
 0x17d   :  { %385 = vsyncpa [#allocation6], 1 }
 0x17e   :  { %387 = vsyncpa [#allocation6 + $0x1], 1 }
 0x17f   :  { %388 = vsyncpa [#allocation9], 1 }

</bundles_post_ra>
